<compile_context>
chip_gen: v7x
topology: tpu7x:2x2x1
jax: 0.10.0
libtpu: 0.0.40
codegen_flags: <defaults>
</compile_context>

<pallas_src>
import jax
import jax.numpy as jnp
from jax.experimental import pallas as pl
from jax.experimental.pallas import tpu as pltpu


def _broadcast_kernel(xi_ref, xj_ref, o_ref):
    """out[r, c, k] = 3 * xj[c, k] + xi[r, k].

    xi_ref: (TI, M) rows x[i*TI : i*TI + TI]  (broadcast axis of the output)
    xj_ref: (TJ, M) rows x[j*TJ : j*TJ + TJ]  (the `3*x` axis of the output)
    o_ref : (TI, TJ, M) lane-dense output slab for grid step (i, j)
    """
    # Multiply on the small un-broadcast (TJ, M) shape (HBM-store bound kernel,
    # VALU slack is plentiful), then broadcast-add straight into the output.
    o_ref[...] = (xj_ref[...] * 3)[None, :, :] + xi_ref[...][:, None, :]


def _vmem_limit_bytes():
    """Generation-aware VMEM limit (raised explicitly, with headroom)."""
    cap = 64 << 20  # conservative fallback: v7x physical VMEM per TensorCore
    try:
        info = pltpu.get_tpu_info()
        cap = int(getattr(info, "vmem_capacity_bytes", cap))
    except Exception:  # hardware query unavailable (e.g. off-TPU tracing)
        pass
    # ~3/4 of physical: 96 MiB on v5e/v6e (128 MiB), 48 MiB on v7x (64 MiB).
    return max(32 << 20, min((cap * 3) // 4, 112 << 20))


def _pick_tiles(n, m, itemsize, vmem_limit_bytes, out_block_bytes=None):
    """Pick (TI, TJ) row-tile sizes for the (cdiv(N,TI), cdiv(N,TJ)) grid."""
    pack = max(8, 32 // itemsize)  # sublane pack: 8 f32, 16 bf16, 32 int8
    row = m * itemsize             # bytes per (1, M) row

    def fit(rows):
        # Legal row counts under the (8,128) rule: multiple of `pack`, or N.
        if rows >= n:
            return n
        if n <= pack:
            return n
        return max(pack, (rows // pack) * pack)

    # Budgets: double-buffered output block dominates VMEM; keep it at ~1/6 of
    # the raised limit (≈16 MiB on 128 MiB parts, ≈8 MiB on v7x); keep the
    # per-step (TJ, M) input block much smaller.
    if out_block_bytes is None:
        out_block_bytes = min(16 << 20, vmem_limit_bytes // 6)
    out_block_bytes = max(out_block_bytes, pack * pack * row)
    xj_bytes = max(pack * row, min(8 << 20, vmem_limit_bytes // 12))

    tj = n if n * row <= xj_bytes else fit(xj_bytes // row)
    ti = fit(out_block_bytes // (tj * row))

    # Prefer >= 4 total grid steps (2 per TensorCore under v7x megacore) when
    # the problem is big enough, without dropping below ~1 MiB output blocks.
    if pl.cdiv(n, ti) * pl.cdiv(n, tj) < 4 and n > pack:
        cand = fit(pl.cdiv(n, 4))
        if cand < ti and cand * tj * row >= (1 << 20):
            ti = cand
    return ti, tj


def _build_call(n, m, ti, tj, dtype, vmem_limit_bytes):
    itemsize = jnp.dtype(dtype).itemsize
    cost = pl.CostEstimate(
        flops=2 * n * n * m,
        transcendentals=0,
        bytes_accessed=(n * n * m + 2 * n * m) * itemsize,
    )
    return pl.pallas_call(
        _broadcast_kernel,
        out_shape=jax.ShapeDtypeStruct((n, n, m), dtype),
        grid_spec=pltpu.PrefetchScalarGridSpec(
            num_scalar_prefetch=0,
            grid=(pl.cdiv(n, ti), pl.cdiv(n, tj)),
            in_specs=[
                pl.BlockSpec((ti, m), lambda i, j: (i, 0)),  # broadcast-i rows
                pl.BlockSpec((tj, m), lambda i, j: (j, 0)),  # 3*x target rows
            ],
            out_specs=pl.BlockSpec((ti, tj, m), lambda i, j: (i, j, 0)),
        ),
        compiler_params=pltpu.CompilerParams(
            dimension_semantics=("parallel", "parallel"),
            vmem_limit_bytes=vmem_limit_bytes,
        ),
        cost_estimate=cost,
    )


def broadcast_forward(x, *, out_block_bytes=None):
    n, m = x.shape
    itemsize = jnp.dtype(x.dtype).itemsize
    vmem_limit = _vmem_limit_bytes()
    ti, tj = _pick_tiles(n, m, itemsize, vmem_limit, out_block_bytes)
    call = _build_call(n, m, ti, tj, x.dtype, vmem_limit)
    # The same array feeds both input specs (row slabs along each output axis).
    return call(x, x)


def broadcast_ref(x):
    n, m = x.shape
    x1 = x + x.reshape(1, n, m)
    x2 = x + x.reshape(n, 1, m)
    return x1 + x2


if __name__ == "__main__":
    key = jax.random.PRNGKey(0)

    # Primary test at the shape family implied by the module.
    x = jax.random.normal(key, (8, 128), dtype=jnp.float32)
    out = jax.block_until_ready(broadcast_forward(x))
    assert out.shape == (8, 8, 128), out.shape
    assert jnp.allclose(out, broadcast_ref(x), atol=1e-5, rtol=1e-5)

    # Exercise the tiled path: multi-step grid with small forced output blocks.
    x2 = jax.random.normal(jax.random.PRNGKey(0), (24, 256), dtype=jnp.float32)
    out2 = jax.block_until_ready(broadcast_forward(x2, out_block_bytes=64 << 10))
    assert out2.shape == (24, 24, 256), out2.shape
    assert jnp.allclose(out2, broadcast_ref(x2), atol=1e-5, rtol=1e-5)

    # Exercise a non-divisible N (cdiv grid, partial last block via padding).
    x3 = jax.random.normal(jax.random.PRNGKey(0), (20, 128), dtype=jnp.float32)
    out3 = jax.block_until_ready(broadcast_forward(x3, out_block_bytes=32 << 10))
    assert out3.shape == (20, 20, 128), out3.shape
    assert jnp.allclose(out3, broadcast_ref(x3), atol=1e-5, rtol=1e-5)

    print("KERNEL_OK")
</pallas_src>

<mosaic_0001>
module attributes {stable_mosaic.version = 11 : i64} {
  func.func @_broadcast_kernel(%arg0: i32, %arg1: i32, %arg2: memref<8x128xf32, #tpu.memory_space<vmem>>, %arg3: memref<8x128xf32, #tpu.memory_space<vmem>>, %arg4: memref<8x8x128xf32, #tpu.memory_space<vmem>>) attributes {dimension_semantics = [#tpu.dimension_semantics<parallel>, #tpu.dimension_semantics<parallel>], iteration_bounds = array<i64: 1, 1>, scalar_prefetch = 0 : i64, scratch_operands = 0 : i64, tpu.core_type = #tpu.core_type<tc>, window_params = [{transform_indices = @transform_0, window_bounds = array<i64: 8, 128>}, {transform_indices = @transform_1, window_bounds = array<i64: 8, 128>}, {transform_indices = @transform_2, window_bounds = array<i64: 8, 8, 128>}]} {
    %c0 = arith.constant 0 : index
    %c0_0 = arith.constant 0 : index
    %0 = vector.load %arg3[%c0, %c0_0] : memref<8x128xf32, #tpu.memory_space<vmem>>, vector<8x128xf32>
    %cst = arith.constant 3.000000e+00 : f32
    %1 = vector.broadcast %cst : f32 to vector<8x128xf32>
    %2 = arith.mulf %0, %1 : vector<8x128xf32>
    %3 = vector.shape_cast %2 : vector<8x128xf32> to vector<1x8x128xf32>
    %c0_1 = arith.constant 0 : index
    %c0_2 = arith.constant 0 : index
    %4 = vector.load %arg2[%c0_1, %c0_2] : memref<8x128xf32, #tpu.memory_space<vmem>>, vector<8x128xf32>
    %5 = vector.shape_cast %4 : vector<8x128xf32> to vector<8x1x128xf32>
    %6 = vector.broadcast %3 : vector<1x8x128xf32> to vector<8x8x128xf32>
    %7 = vector.broadcast %5 : vector<8x1x128xf32> to vector<8x8x128xf32>
    %8 = arith.addf %6, %7 : vector<8x8x128xf32>
    %c0_3 = arith.constant 0 : index
    %c0_4 = arith.constant 0 : index
    %c0_5 = arith.constant 0 : index
    %9 = vector.load %arg4[%c0_3, %c0_4, %c0_5] : memref<8x8x128xf32, #tpu.memory_space<vmem>>, vector<8x8x128xf32>
    tpu.vector_store %arg4[%c0_3, %c0_4, %c0_5], %8 {strides = array<i32>} : memref<8x8x128xf32, #tpu.memory_space<vmem>>, vector<8x8x128xf32>,
    return
  }
  func.func @transform_0(%arg0: i32, %arg1: i32) -> (i32, i32) {
    %c0_i32 = arith.constant 0 : i32
    %c0_i32_0 = arith.constant 0 : i32
    return %arg0, %c0_i32 : i32, i32
  }
  func.func @transform_1(%arg0: i32, %arg1: i32) -> (i32, i32) {
    %c0_i32 = arith.constant 0 : i32
    %c0_i32_0 = arith.constant 0 : i32
    return %arg1, %c0_i32 : i32, i32
  }
  func.func @transform_2(%arg0: i32, %arg1: i32) -> (i32, i32, i32) {
    %c0_i32 = arith.constant 0 : i32
    %c0_i32_0 = arith.constant 0 : i32
    return %arg0, %arg1, %c0_i32 : i32, i32, i32
  }
}

</mosaic_0001>

<bundles_post_ra>
// kernel: tpu_custom_call.1
= control target key start
LH: loop header
LB: loop body
LE: loop exit
PB: predicated region body
PF: predicated region fallthrough
CT: control target
= control target key end

     0   :  { %7 = vsyncpa [#allocation3], 0  ;;  %s299_s0 = inlined_call_operand.hbm [shape: f32[8,128], index: 0, kind: input, shape index: {}]   ;;  %s300_s1 = inlined_call_operand.hbm [shape: f32[8,128], index: 1, kind: input, shape index: {}]   ;;  %s301_s2 = inlined_call_operand.hbm [shape: f32[8,8,128], index: 2, kind: output, shape index: {}]  }
   0x1   :  { %8 = vsyncpa [#allocation6], 0 }
   0x2   :  { %9 = vsyncpa [#allocation4], 0  ;;  %s242_s9 = smov [#allocation2]   ;;  %s243_s11 = smov [#allocation5]  }
   0x3   :  { %s16_s10 = sshll.u32 %s242_s9, 4  ;;  %s26_s12 = sshll.u32 %s243_s11, 4  ;;  %s17_s10 = int_to_ptr.vmem [resolvable:$true] %s16_s10  ;;  %s27_s12 = int_to_ptr.vmem [resolvable:$true] %s26_s12 }
   0x4   :  { %s170_s15 = scalar_lea.hbm %s299_s0, 128 }
   0x5   :  { %p171_p0 = scmp.ne.s32.totalorder %s299_s0, %s170_s15  ;;  %p174_p1 = scmp.lt.u32.totalorder %s170_s15, %s299_s0 }
   0x7   :  { %p176_p2 = pnand %p174_p1, %p171_p0 }
   0x9   :  { %179 = shalt.err (!%p176_p2)
}
   0xa   :  { %s180_s20 = scalar_lea.vmem %s17_s10, 128  ;;  %p185_p4 = scmp.lt.s32.totalorder %s17_s10, %s17_s10 }
   0xb   :  { %p181_p3 = scmp.ne.s32.totalorder %s17_s10, %s180_s20  ;;  %p186_p5 = scmp.lt.s32.totalorder %s180_s20, %s180_s20 }
   0xd   :  { %p187_p6 = por %p186_p5, %p185_p4 }
   0xf   :  { %p188_p7 = pnand %p187_p6, %p181_p3 }
  0x11   :  { %191 = shalt.err (!%p188_p7)
}
  0x12   :  { %19 = dma.hbm_to_vmem [thread:$0]  %s299_s0, 128, %s17_s10, [#allocation3]  }
  0x13   :  { %s192_s25 = scalar_lea.hbm %s300_s1, 128 }
  0x14   :  { %p193_p8 = scmp.ne.s32.totalorder %s300_s1, %s192_s25  ;;  %p196_p9 = scmp.lt.u32.totalorder %s192_s25, %s300_s1 }
  0x16   :  { %p198_p10 = pnand %p196_p9, %p193_p8 }
  0x18   :  { %201 = shalt.err (!%p198_p10)
}
  0x19   :  { %s202_s30 = scalar_lea.vmem %s27_s12, 128  ;;  %p207_p12 = scmp.lt.s32.totalorder %s27_s12, %s27_s12 }
  0x1a   :  { %p203_p11 = scmp.ne.s32.totalorder %s27_s12, %s202_s30  ;;  %p208_p13 = scmp.lt.s32.totalorder %s202_s30, %s202_s30 }
  0x1c   :  { %p209_p0 = por %p208_p13, %p207_p12 }
  0x1e   :  { %p210_p1 = pnand %p209_p0, %p203_p11 }
  0x20   :  { %213 = shalt.err (!%p210_p1)
}
  0x21   :  { %29 = dma.hbm_to_vmem [thread:$0]  %s300_s1, 128, %s27_s12, [#allocation6]  }
  0x22   :  { %236 = dma.done.wait [#allocation3], 128  }
  0x23   :  { %237 = vsyncadd [#allocation3], 4294967168 }
  0x24   :  { %238 = dma.done.wait [#allocation6], 128  }
  0x25   :  { %239 = vsyncadd [#allocation6], 4294967168  ;;  %v44_v0 = vlaneseq  ;;  %v244_v1 = vmov 1966171168   ;;  %v36_v6 = vld [vmem:[#allocation5] sm:$0xff]  ;;  %v38_v7 = vld [vmem:[#allocation2] sm:$0xff] }
  0x26   :  { %v42_v2 = vunpack.c.l.s4 %v244_v1  ;;  %v40_v10 = vcombine.high %v38_v7, %v38_v7  ;;  %v37_v11 = vmul.f32 3.0, %v36_v6  ;;  %s245_s1 = smov [#allocation7]  }
  0x27   :  { %v45_v3 = vshrl.u32 %v44_v0, 7  ;;  %s150_s4 = sshll.u32 %s245_s1, 4  ;;  %s151_s4 = int_to_ptr.vmem [resolvable:$true] %s150_s4 }
  0x28   :  { %v43_v4 = vunpack.c.0.s8 %v42_v2  ;;  %s214_s5 = scalar_lea.vmem %s151_s4, 1024  ;;  %p219_p3 = scmp.lt.s32.totalorder %s151_s4, %s151_s4 }
  0x29   :  { %v91_v9 = vsub.s32 0, %v45_v3  ;;  %p215_p2 = scmp.ne.s32.totalorder %s151_s4, %s214_s5  ;;  %p220_p4 = scmp.lt.s32.totalorder %s214_s5, %s214_s5 }
  0x2a   :  { %v46_v5 = vsub.s32 %v43_v4, %v45_v3 }
  0x2b   :  { %p221_p5 = por %p220_p4, %p219_p3 }
  0x2c   :  { %v47_v8 = vrot.slane %v38_v7, %v46_v5  ;;  %v54_v14 = vrot.slane %v40_v10, %v46_v5 }
  0x2d   :  { %p222_p6 = pnand %p221_p5, %p215_p2 }
  0x2e   :  { %v63_v12 = vrot.slane %v47_v8, %v46_v5  ;;  %v55_v13 = vcombine.high %v47_v8, %v47_v8  ;;  %v70_v18 = vrot.slane %v54_v14, %v46_v5  ;;  %v56_v19 = vcombine.high %v54_v14, %v54_v14 }
  0x30   :  { %v92_v15 = vrot.slane %v63_v12, %v91_v9  ;;  %v77_v16 = vrot.slane %v55_v13, %v46_v5  ;;  %v85_v17 = vcombine.high %v63_v12, %v63_v12  ;;  %v108_v24 = vrot.slane %v70_v18, %v91_v9 }
  0x31   :  { %v84_v25 = vrot.slane %v56_v19, %v46_v5  ;;  %v86_v26 = vcombine.high %v70_v18, %v70_v18 }
  0x32   :  { %v129_v20 = vadd.f32 %v92_v15, %v37_v11  ;;  %v96_v21 = vrot.slane %v77_v16, %v91_v9  ;;  %v100_v22 = vrot.slane %v85_v17, %v91_v9  ;;  %v87_v23 = vcombine.high %v77_v16, %v77_v16 }
  0x33   :  { %v133_v30 = vadd.f32 %v108_v24, %v37_v11  ;;  %v112_v31 = vrot.slane %v84_v25, %v91_v9  ;;  %v116_v32 = vrot.slane %v86_v26, %v91_v9  ;;  %v88_v33 = vcombine.high %v84_v25, %v84_v25 }
  0x34   :  { %137 = vst [vmem:[#allocation7] sm:$0xff] %v129_v20  ;;  %v130_v27 = vadd.f32 %v96_v21, %v37_v11  ;;  %v131_v28 = vadd.f32 %v100_v22, %v37_v11  ;;  %v104_v29 = vrot.slane %v87_v23, %v91_v9 }
  0x35   :  { %141 = vst [vmem:[#allocation7 + $0x20] sm:$0xff] %v133_v30  ;;  %v134_v35 = vadd.f32 %v112_v31, %v37_v11  ;;  %v135_v36 = vadd.f32 %v116_v32, %v37_v11  ;;  %v120_v37 = vrot.slane %v88_v33, %v91_v9 }
  0x36   :  { %138 = vst [vmem:[#allocation7 + $0x8] sm:$0xff] %v130_v27  ;;  %139 = vst [vmem:[#allocation7 + $0x10] sm:$0xff] %v131_v28  ;;  %v132_v34 = vadd.f32 %v104_v29, %v37_v11 }
  0x37   :  { %142 = vst [vmem:[#allocation7 + $0x28] sm:$0xff] %v134_v35  ;;  %143 = vst [vmem:[#allocation7 + $0x30] sm:$0xff] %v135_v36  ;;  %v136_v38 = vadd.f32 %v120_v37, %v37_v11 }
  0x38   :  { %140 = vst [vmem:[#allocation7 + $0x18] sm:$0xff] %v132_v34 }
  0x39   :  { %144 = vst [vmem:[#allocation7 + $0x38] sm:$0xff] %v136_v38 }
  0x3a   :  { %225 = shalt.err (!%p222_p6)
}
  0x3b   :  { %s226_s8 = scalar_lea.hbm %s301_s2, 1024 }
  0x3c   :  { %p227_p7 = scmp.ne.s32.totalorder %s301_s2, %s226_s8  ;;  %p230_p8 = scmp.lt.u32.totalorder %s226_s8, %s301_s2 }
  0x3e   :  { %p232_p9 = pnand %p230_p8, %p227_p7 }
  0x40   :  { %235 = shalt.err (!%p232_p9)
}
  0x41   :  { %s246_s13 = smov 128   ;;  %s247_s14 = smov 8  }
  0x42   :  { %156 = dma.vmem_to_hbm [thread:$0]  %s151_s4, 1024, %s301_s2, [#allocation4], %s246_s13, %s246_s13, %s247_s14  }
  0x43   :  { %240 = dma.done.wait [#allocation4], 1024  }
  0x44   :  { %241 = vsyncadd [#allocation4], 4294966272 }
  0x45   :  { %160 = vsyncpa [#allocation3], 1 }
  0x46   :  { %161 = vsyncpa [#allocation6], 1 }
  0x47   :  { %162 = vsyncpa [#allocation4], 1 }

</bundles_post_ra>
